<compile_context>
chip_gen: v7x
topology: tpu7x:2x2x1
jax: 0.10.0
libtpu: 0.0.40
codegen_flags: <defaults>
</compile_context>

<pallas_src>
import functools

import jax
import jax.numpy as jnp
from jax.experimental import pallas as pl
from jax.experimental.pallas import tpu as pltpu

_LANE = 128      # feature dims padded to multiples of this (lane-dense output)
_SUBLANE = 8     # batch tiles padded to multiples of this


def _round_up(v, m):
    return ((v + m - 1) // m) * m


def _mlp_kernel(x_ref, w0_ref, b0_ref, w1_ref, b1_ref, o_ref, *, negative_slope):
    """Fused 1-hidden-layer MLP forward for one batch tile.

    x_ref  : (bt, in_p)    bf16 input tile
    w0/b0  : (in_p, hid_p) bf16 / (1, hid_p) f32
    w1/b1  : (hid_p, out_p) bf16 / (1, out_p) f32
    o_ref  : (bt, out_p)
    """
    # hidden dense layer: bf16 operands on the MXU, f32 accumulation
    h = jnp.dot(x_ref[...], w0_ref[...], preferred_element_type=jnp.float32)
    h = h + b0_ref[...]                                   # f32 bias add (VPU)
    # LeakyReLU(0.05), kept in f32 (cheapest path on v5e, free on v6e/v7x)
    h = jnp.where(h >= 0, h, negative_slope * h)
    # output dense layer (linear, no activation on the last layer per _build_mlp)
    y = jnp.dot(h.astype(w1_ref.dtype), w1_ref[...],
                preferred_element_type=jnp.float32)
    y = y + b1_ref[...]
    o_ref[...] = y.astype(o_ref.dtype)


def mlp_forward(x, w0, b0, w1, b1, *, block_batch=512, negative_slope=0.05,
                vmem_budget_bytes=32 * 1024 * 1024):
    """Forward of BaseModel._build_mlp(n_hid_layers=1, activation='lrelu').

    Computes  y = lrelu(x @ w0 + b0, 0.05) @ w1 + b1  with weights stored
    (in, out), i.e. transposed relative to torch nn.Linear.weight.
    Handles arbitrary batch / feature sizes via zero padding.
    """
    n, in_size = x.shape
    hid_size = w0.shape[1]
    out_size = w1.shape[1]
    out_dtype = x.dtype

    # --- lane-dense padding of feature dims (multiples of 128) ---------------
    in_p = _round_up(in_size, _LANE)
    hid_p = _round_up(hid_size, _LANE)
    out_p = _round_up(out_size, _LANE)

    # --- pick a batch tile sized against a v7x-safe VMEM budget --------------
    bt = min(_round_up(block_batch, _SUBLANE), _round_up(n, _SUBLANE))
    weight_bytes = (2 * (in_p * hid_p + hid_p * out_p) * 2      # bf16 weights (dbl-buf)
                    + 2 * (hid_p + out_p) * 4)                  # f32 biases (dbl-buf)

    def _vmem_estimate(bt_):
        io = 2 * bt_ * in_p * 2 + 2 * bt_ * out_p * 4           # dbl-buffered in/out tiles
        scratch = bt_ * (hid_p + out_p) * 4                     # f32 intermediates
        return io + weight_bytes + scratch

    while bt > _SUBLANE and _vmem_estimate(bt) > vmem_budget_bytes:
        bt = max(_SUBLANE, _round_up(bt // 2, _SUBLANE))

    # --- pad the batch so the grid is an integer (and, when >1, even) #tiles --
    num_blocks = max(1, -(-n // bt))            # cdiv
    if num_blocks > 1 and num_blocks % 2 == 1:
        num_blocks += 1                         # even grid -> both v7x TCs get work
    n_p = num_blocks * bt

    # --- zero-pad operands; bf16 matmul operands, f32 biases ------------------
    xp = jnp.pad(x.astype(jnp.bfloat16), ((0, n_p - n), (0, in_p - in_size)))
    w0p = jnp.pad(w0.astype(jnp.bfloat16),
                  ((0, in_p - in_size), (0, hid_p - hid_size)))
    b0p = jnp.pad(b0.astype(jnp.float32).reshape(1, hid_size),
                  ((0, 0), (0, hid_p - hid_size)))
    w1p = jnp.pad(w1.astype(jnp.bfloat16),
                  ((0, hid_p - hid_size), (0, out_p - out_size)))
    b1p = jnp.pad(b1.astype(jnp.float32).reshape(1, out_size),
                  ((0, 0), (0, out_p - out_size)))

    kernel = functools.partial(_mlp_kernel, negative_slope=negative_slope)
    vmem_limit = int(min(64 * 1024 * 1024,
                         max(16 * 1024 * 1024, 2 * _vmem_estimate(bt))))

    out_padded = pl.pallas_call(
        kernel,
        out_shape=jax.ShapeDtypeStruct((n_p, out_p), out_dtype),
        grid_spec=pltpu.PrefetchScalarGridSpec(
            num_scalar_prefetch=0,
            grid=(num_blocks,),
            in_specs=[
                # batch-tiled input
                pl.BlockSpec((bt, in_p), lambda i: (i, 0)),
                # weights / biases: constant index_map -> fetched once, resident
                # (pipeline_mode=pl.Buffered(1) would halve their VMEM footprint;
                #  negligible at daart-scale hidden sizes so omitted for portability)
                pl.BlockSpec((in_p, hid_p), lambda i: (0, 0)),
                pl.BlockSpec((1, hid_p), lambda i: (0, 0)),
                pl.BlockSpec((hid_p, out_p), lambda i: (0, 0)),
                pl.BlockSpec((1, out_p), lambda i: (0, 0)),
            ],
            out_specs=pl.BlockSpec((bt, out_p), lambda i: (i, 0)),
        ),
        compiler_params=pltpu.CompilerParams(
            dimension_semantics=("parallel",),
            vmem_limit_bytes=vmem_limit,
        ),
    )(xp, w0p, b0p, w1p, b1p)

    # strip batch + lane padding outside the kernel (cheap XLA slice)
    return out_padded[:n, :out_size]


def init_linear_params(key, in_size, out_size, dtype=jnp.float32):
    """Deterministic init matching torch nn.Linear default: U(-1/sqrt(in), 1/sqrt(in))."""
    kw, kb = jax.random.split(key)
    bound = 1.0 / (in_size ** 0.5)
    # stored as (in, out) = torch weight.T
    w = jax.random.uniform(kw, (in_size, out_size), dtype, minval=-bound, maxval=bound)
    b = jax.random.uniform(kb, (out_size,), dtype, minval=-bound, maxval=bound)
    return w, b


def reference_mlp(x, w0, b0, w1, b1, negative_slope=0.05):
    h = x @ w0 + b0
    h = jnp.where(h >= 0, h, negative_slope * h)
    return h @ w1 + b1


if __name__ == "__main__":
    # small shapes consistent with _build_mlp(in_size, hid_size, out_size, n_hid_layers=1)
    batch, in_size, hid_size, out_size = 16, 32, 32, 16

    key = jax.random.PRNGKey(0)
    kx, k0, k1, kx2 = jax.random.split(key, 4)

    x = jax.random.normal(kx, (batch, in_size), jnp.float32)
    w0, b0 = init_linear_params(k0, in_size, hid_size)   # dense_layer_00 + lrelu_00
    w1, b1 = init_linear_params(k1, hid_size, out_size)  # dense_layer_01 (linear)

    out = jax.block_until_ready(mlp_forward(x, w0, b0, w1, b1))
    ref = reference_mlp(x, w0, b0, w1, b1)
    assert out.shape == (batch, out_size)
    # bf16 matmul operands with f32 accumulation -> loosened tolerance vs f32 reference
    assert jnp.allclose(out, ref, atol=5e-2, rtol=5e-2), "mismatch vs reference"

    # second case: non-divisible / multi-block batch to exercise padding + even grid
    x2 = jax.random.normal(kx2, (72, in_size), jnp.float32)
    out2 = jax.block_until_ready(mlp_forward(x2, w0, b0, w1, b1, block_batch=32))
    ref2 = reference_mlp(x2, w0, b0, w1, b1)
    assert out2.shape == (72, out_size)
    assert jnp.allclose(out2, ref2, atol=5e-2, rtol=5e-2), "mismatch vs reference (padded)"

    # TODO(synk): BaseModel.forward/training_step/save/load are abstract or I/O-only;
    # only the _build_mlp/_build_linear compute path is implemented here.
    print("KERNEL_OK")
</pallas_src>

<mosaic_0001>
module attributes {stable_mosaic.version = 11 : i64} {
  func.func @_mlp_kernel(%arg0: i32, %arg1: memref<16x128xbf16, #tpu.memory_space<vmem>>, %arg2: memref<128x128xbf16, #tpu.memory_space<vmem>>, %arg3: memref<1x128xf32, #tpu.memory_space<vmem>>, %arg4: memref<128x128xbf16, #tpu.memory_space<vmem>>, %arg5: memref<1x128xf32, #tpu.memory_space<vmem>>, %arg6: memref<16x128xf32, #tpu.memory_space<vmem>>) attributes {dimension_semantics = [#tpu.dimension_semantics<parallel>], iteration_bounds = array<i64: 1>, scalar_prefetch = 0 : i64, scratch_operands = 0 : i64, tpu.core_type = #tpu.core_type<tc>, window_params = [{transform_indices = @transform_0, window_bounds = array<i64: 16, 128>}, {pipeline_mode = #tpu.pipeline_mode<synchronous>, transform_indices = @transform_1, window_bounds = array<i64: 128, 128>}, {pipeline_mode = #tpu.pipeline_mode<synchronous>, transform_indices = @transform_2, window_bounds = array<i64: 1, 128>}, {pipeline_mode = #tpu.pipeline_mode<synchronous>, transform_indices = @transform_3, window_bounds = array<i64: 128, 128>}, {pipeline_mode = #tpu.pipeline_mode<synchronous>, transform_indices = @transform_4, window_bounds = array<i64: 1, 128>}, {transform_indices = @transform_5, window_bounds = array<i64: 16, 128>}]} {
    %c0 = arith.constant 0 : index
    %c0_0 = arith.constant 0 : index
    %0 = vector.load %arg1[%c0, %c0_0] : memref<16x128xbf16, #tpu.memory_space<vmem>>, vector<16x128xbf16>
    %c0_1 = arith.constant 0 : index
    %c0_2 = arith.constant 0 : index
    %1 = vector.load %arg2[%c0_1, %c0_2] : memref<128x128xbf16, #tpu.memory_space<vmem>>, vector<128x128xbf16>
    %cst = arith.constant dense<0.000000e+00> : vector<16x128xf32>
    %2 = tpu.matmul %0, %1, %cst {dimension_numbers = #tpu.dot_dimension_numbers<[1], [0], [0], [1], [0, 0, 1, 1], [], []>} : vector<16x128xbf16>, vector<128x128xbf16>, vector<16x128xf32> -> vector<16x128xf32>
    %c0_3 = arith.constant 0 : index
    %c0_4 = arith.constant 0 : index
    %3 = vector.load %arg3[%c0_3, %c0_4] : memref<1x128xf32, #tpu.memory_space<vmem>>, vector<1x128xf32>
    %4 = vector.broadcast %3 : vector<1x128xf32> to vector<16x128xf32>
    %5 = arith.addf %2, %4 : vector<16x128xf32>
    %cst_5 = arith.constant 0.000000e+00 : f32
    %6 = vector.broadcast %cst_5 : f32 to vector<16x128xf32>
    %7 = arith.cmpf oge, %5, %6 : vector<16x128xf32>
    %cst_6 = arith.constant 5.000000e-02 : f32
    %8 = vector.broadcast %cst_6 : f32 to vector<16x128xf32>
    %9 = arith.mulf %8, %5 : vector<16x128xf32>
    %10 = arith.select %7, %5, %9 : vector<16x128xi1>, vector<16x128xf32>
    %11 = arith.truncf %10 : vector<16x128xf32> to vector<16x128xbf16>
    %c0_7 = arith.constant 0 : index
    %c0_8 = arith.constant 0 : index
    %12 = vector.load %arg4[%c0_7, %c0_8] : memref<128x128xbf16, #tpu.memory_space<vmem>>, vector<128x128xbf16>
    %cst_9 = arith.constant dense<0.000000e+00> : vector<16x128xf32>
    %13 = tpu.matmul %11, %12, %cst_9 {dimension_numbers = #tpu.dot_dimension_numbers<[1], [0], [0], [1], [0, 0, 1, 1], [], []>} : vector<16x128xbf16>, vector<128x128xbf16>, vector<16x128xf32> -> vector<16x128xf32>
    %c0_10 = arith.constant 0 : index
    %c0_11 = arith.constant 0 : index
    %14 = vector.load %arg5[%c0_10, %c0_11] : memref<1x128xf32, #tpu.memory_space<vmem>>, vector<1x128xf32>
    %15 = vector.broadcast %14 : vector<1x128xf32> to vector<16x128xf32>
    %16 = arith.addf %13, %15 : vector<16x128xf32>
    %c0_12 = arith.constant 0 : index
    %c0_13 = arith.constant 0 : index
    %17 = vector.load %arg6[%c0_12, %c0_13] : memref<16x128xf32, #tpu.memory_space<vmem>>, vector<16x128xf32>
    tpu.vector_store %arg6[%c0_12, %c0_13], %16 {strides = array<i32>} : memref<16x128xf32, #tpu.memory_space<vmem>>, vector<16x128xf32>,
    return
  }
  func.func @transform_0(%arg0: i32) -> (i32, i32) {
    %c0_i32 = arith.constant 0 : i32
    %c0_i32_0 = arith.constant 0 : i32
    return %arg0, %c0_i32 : i32, i32
  }
  func.func @transform_1(%arg0: i32) -> (i32, i32) {
    %c0_i32 = arith.constant 0 : i32
    %c0_i32_0 = arith.constant 0 : i32
    %c0_i32_1 = arith.constant 0 : i32
    return %c0_i32, %c0_i32_0 : i32, i32
  }
  func.func @transform_2(%arg0: i32) -> (i32, i32) {
    %c0_i32 = arith.constant 0 : i32
    %c0_i32_0 = arith.constant 0 : i32
    %c0_i32_1 = arith.constant 0 : i32
    return %c0_i32, %c0_i32_0 : i32, i32
  }
  func.func @transform_3(%arg0: i32) -> (i32, i32) {
    %c0_i32 = arith.constant 0 : i32
    %c0_i32_0 = arith.constant 0 : i32
    %c0_i32_1 = arith.constant 0 : i32
    return %c0_i32, %c0_i32_0 : i32, i32
  }
  func.func @transform_4(%arg0: i32) -> (i32, i32) {
    %c0_i32 = arith.constant 0 : i32
    %c0_i32_0 = arith.constant 0 : i32
    %c0_i32_1 = arith.constant 0 : i32
    return %c0_i32, %c0_i32_0 : i32, i32
  }
  func.func @transform_5(%arg0: i32) -> (i32, i32) {
    %c0_i32 = arith.constant 0 : i32
    %c0_i32_0 = arith.constant 0 : i32
    return %arg0, %c0_i32 : i32, i32
  }
}

</mosaic_0001>

<bundles_post_ra>
// kernel: tpu_custom_call.1
= control target key start
LH: loop header
LB: loop body
LE: loop exit
PB: predicated region body
PF: predicated region fallthrough
CT: control target
= control target key end

     0   :  { %10 = vsyncpa [#allocation3], 0  ;;  %s630_s0 = inlined_call_operand.hbm [shape: bf16[16,128], index: 0, kind: input, shape index: {}]   ;;  %s631_s1 = inlined_call_operand.hbm [shape: bf16[128,128], index: 1, kind: input, shape index: {}]   ;;  %s632_s2 = inlined_call_operand.vmem [shape: f32[1,128], index: 2, kind: input, shape index: {}]   ;;  %s633_s3 = inlined_call_operand.hbm [shape: bf16[128,128], index: 3, kind: input, shape index: {}]   ;;  %s634_s4 = inlined_call_operand.vmem [shape: f32[1,128], index: 4, kind: input, shape index: {}]   ;;  %s635_s5 = inlined_call_operand.hbm [shape: f32[16,128], index: 5, kind: output, shape index: {}]  }
   0x1   :  { %11 = vsyncpa [#allocation6], 0 }
   0x2   :  { %12 = vsyncpa [#allocation4], 0  ;;  %s520_s18 = smov [#allocation5]   ;;  %s521_s20 = smov [#allocation2]  }
   0x3   :  { %s30_s19 = sshll.u32 %s520_s18, 4  ;;  %s18_s21 = sshll.u32 %s521_s20, 4  ;;  %s31_s19 = int_to_ptr.vmem [resolvable:$true] %s30_s19  ;;  %s560_s21 = int_to_ptr.vmem [resolvable:$true] %s18_s21 }
   0x4   :  { %s426_s24 = scalar_lea.hbm %s631_s1, 1024 }
   0x5   :  { %p427_p0 = scmp.ne.s32.totalorder %s631_s1, %s426_s24  ;;  %p430_p1 = scmp.lt.u32.totalorder %s426_s24, %s631_s1 }
   0x7   :  { %p432_p2 = pnand %p430_p1, %p427_p0 }
   0x9   :  { %435 = shalt.err (!%p432_p2)
}
   0xa   :  { %s436_s29 = scalar_lea.vmem %s31_s19, 1024  ;;  %p441_p4 = scmp.lt.s32.totalorder %s31_s19, %s31_s19 }
   0xb   :  { %p437_p3 = scmp.ne.s32.totalorder %s31_s19, %s436_s29  ;;  %p442_p5 = scmp.lt.s32.totalorder %s436_s29, %s436_s29 }
   0xd   :  { %p443_p6 = por %p442_p5, %p441_p4 }
   0xf   :  { %p444_p7 = pnand %p443_p6, %p437_p3 }
  0x11   :  { %447 = shalt.err (!%p444_p7)
}
  0x12   :  { %s522_s30 = smov 64   ;;  %s523_s6 = smov 4  }
  0x13   :  { %36 = dma.hbm_to_vmem [thread:$0]  %s631_s1, 1024, %s31_s19, [#allocation6], %s522_s30, %s522_s30, %s523_s6  }
  0x14   :  { %s448_s11 = scalar_lea.hbm %s630_s0, 128 }
  0x15   :  { %p449_p8 = scmp.ne.s32.totalorder %s630_s0, %s448_s11  ;;  %p452_p9 = scmp.lt.u32.totalorder %s448_s11, %s630_s0 }
  0x17   :  { %p454_p10 = pnand %p452_p9, %p449_p8 }
  0x19   :  { %457 = shalt.err (!%p454_p10)
}
  0x1a   :  { %s458_s16 = scalar_lea.vmem %s560_s21, 128  ;;  %p463_p12 = scmp.lt.s32.totalorder %s560_s21, %s560_s21 }
  0x1b   :  { %p459_p11 = scmp.ne.s32.totalorder %s560_s21, %s458_s16  ;;  %p464_p13 = scmp.lt.s32.totalorder %s458_s16, %s458_s16 }
  0x1d   :  { %p465_p0 = por %p464_p13, %p463_p12 }
  0x1f   :  { %p466_p1 = pnand %p465_p0, %p459_p11 }
  0x21   :  { %469 = shalt.err (!%p466_p1)
}
  0x22   :  { %24 = dma.hbm_to_vmem [thread:$0]  %s630_s0, 128, %s560_s21, [#allocation3], %s522_s30, %s522_s30, %s523_s6  }
  0x23   :  { %s524_s18 = smov [#allocation7]   ;;  %s470_s23 = scalar_lea.hbm %s633_s3, 1024 }
  0x24   :  { %s44_s19 = sshll.u32 %s524_s18, 4  ;;  %p471_p2 = scmp.ne.s32.totalorder %s633_s3, %s470_s23  ;;  %s45_s19 = int_to_ptr.vmem [resolvable:$true] %s44_s19 }
  0x25   :  { %p474_p3 = scmp.lt.u32.totalorder %s470_s23, %s633_s3 }
  0x27   :  { %p476_p4 = pnand %p474_p3, %p471_p2 }
  0x29   :  { %479 = shalt.err (!%p476_p4)
}
  0x2a   :  { %s480_s28 = scalar_lea.vmem %s45_s19, 1024  ;;  %p485_p6 = scmp.lt.s32.totalorder %s45_s19, %s45_s19 }
  0x2b   :  { %p481_p5 = scmp.ne.s32.totalorder %s45_s19, %s480_s28  ;;  %p486_p7 = scmp.lt.s32.totalorder %s480_s28, %s480_s28 }
  0x2d   :  { %p487_p8 = por %p486_p7, %p485_p6 }
  0x2f   :  { %p488_p9 = pnand %p487_p8, %p481_p5 }
  0x31   :  { %491 = shalt.err (!%p488_p9)
}
  0x32   :  { %50 = dma.hbm_to_vmem [thread:$0]  %s633_s3, 1024, %s45_s19, [#allocation6], %s522_s30, %s522_s30, %s523_s6  }
  0x33   :  { %514 = dma.done.wait [#allocation3], 128  }
  0x34   :  { %515 = vsyncadd [#allocation3], 4294967168 }
  0x35   :  { %516 = dma.done.wait [#allocation6], 2048  }
  0x36   :  { %517 = vsyncadd [#allocation6], 4294965248  ;;  %v525_v0 = vmov 0.0   ;;  %vm526_vm0 = vmmov 0   ;;  %v409_v1 = vld [vmem:[#allocation5] sm:$0xff]   ;;  %v410_v2 = vld [vmem:[#allocation5 + $0x8] sm:$0xff]  }
  0x37   :  { %359 = vmatprep.subr.bf16.mxu0 %v525_v0  ;;  %375 = vmatprep.mubr.msk.bf16.mxu0 %vm526_vm0, %v525_v0  ;;  %v411_v3 = vld [vmem:[#allocation5 + $0x10] sm:$0xff]   ;;  %v418_v4 = vld [vmem:[#allocation7] sm:$0xff]   ;;  %v412_v5 = vld [vmem:[#allocation5 + $0x18] sm:$0xff]   ;;  %s527_s7 = smov [#allocation8]  }
  0x38   :  { %379 = vmatprep.subr.bf16.mxu1 %v525_v0  ;;  %395 = vmatprep.mubr.msk.bf16.mxu1 %vm526_vm0, %v525_v0  ;;  %v419_v6 = vld [vmem:[#allocation7 + $0x8] sm:$0xff]   ;;  %v413_v7 = vld [vmem:[#allocation5 + $0x20] sm:$0xff]   ;;  %v420_v8 = vld [vmem:[#allocation7 + $0x10] sm:$0xff]  }
  0x39   :  { %360 = vmatpush3.bf16.msra.mxu0 %v409_v1  ;;  %380 = vmatpush3.bf16.msra.mxu1 %v418_v4  ;;  %v414_v9 = vld [vmem:[#allocation5 + $0x28] sm:$0xff]   ;;  %v421_v10 = vld [vmem:[#allocation7 + $0x18] sm:$0xff]   ;;  %v415_v11 = vld [vmem:[#allocation5 + $0x30] sm:$0xff]  }
  0x3a   :  { %361 = vmatprep.subr.bf16.mxu0 %v525_v0  ;;  %381 = vmatprep.subr.bf16.mxu1 %v525_v0  ;;  %v422_v12 = vld [vmem:[#allocation7 + $0x20] sm:$0xff]   ;;  %v416_v13 = vld [vmem:[#allocation5 + $0x38] sm:$0xff]   ;;  %v423_v14 = vld [vmem:[#allocation7 + $0x28] sm:$0xff]  }
  0x3b   :  { %v417_v15 = vld [vmem:[#allocation2] sm:$0xff]   ;;  %v424_v16 = vld [vmem:[#allocation7 + $0x30] sm:$0xff]  }
  0x3c   :  { %v425_v17 = vld [vmem:[#allocation7 + $0x38] sm:$0xff]  }
  0x3d   :  { %362 = vmatpush3.bf16.msra.mxu0 %v410_v2  ;;  %382 = vmatpush3.bf16.msra.mxu1 %v419_v6  ;;  %v322_v18 = vld [vmem:[%s632_s2] ss:$0 sm:$0xff]  ;;  %s309_s2 = sshll.u32 %s527_s7, 4  ;;  %s310_s2 = int_to_ptr.vmem [resolvable:$true] %s309_s2 }
  0x3e   :  { %363 = vmatprep.subr.bf16.mxu0 %v525_v0  ;;  %383 = vmatprep.subr.bf16.mxu1 %v525_v0  ;;  %v332_v30 = vld [vmem:[%s634_s4] ss:$0 sm:$0xff]  ;;  %s492_s8 = scalar_lea.vmem %s310_s2, 256  ;;  %p497_p11 = scmp.lt.s32.totalorder %s310_s2, %s310_s2 }
  0x3f   :  { %p493_p10 = scmp.ne.s32.totalorder %s310_s2, %s492_s8  ;;  %p498_p12 = scmp.lt.s32.totalorder %s492_s8, %s492_s8 }
  0x41   :  { %364 = vmatpush3.bf16.msra.mxu0 %v411_v3  ;;  %384 = vmatpush3.bf16.msra.mxu1 %v420_v8  ;;  %p499_p13 = por %p498_p12, %p497_p11 }
  0x42   :  { %365 = vmatprep.subr.bf16.mxu0 %v525_v0  ;;  %385 = vmatprep.subr.bf16.mxu1 %v525_v0 }
  0x43   :  { %p500_p0 = pnand %p499_p13, %p493_p10 }
  0x45   :  { %366 = vmatpush3.bf16.msra.mxu0 %v412_v5  ;;  %386 = vmatpush3.bf16.msra.mxu1 %v421_v10 }
  0x46   :  { %367 = vmatprep.subr.bf16.mxu0 %v525_v0  ;;  %387 = vmatprep.subr.bf16.mxu1 %v525_v0 }
  0x49   :  { %368 = vmatpush3.bf16.msra.mxu0 %v413_v7  ;;  %388 = vmatpush3.bf16.msra.mxu1 %v422_v12 }
  0x4a   :  { %369 = vmatprep.subr.bf16.mxu0 %v525_v0  ;;  %389 = vmatprep.subr.bf16.mxu1 %v525_v0 }
  0x4d   :  { %370 = vmatpush3.bf16.msra.mxu0 %v414_v9  ;;  %390 = vmatpush3.bf16.msra.mxu1 %v423_v14 }
  0x4e   :  { %371 = vmatprep.subr.bf16.mxu0 %v525_v0  ;;  %391 = vmatprep.subr.bf16.mxu1 %v525_v0 }
  0x51   :  { %372 = vmatpush3.bf16.msra.mxu0 %v415_v11  ;;  %392 = vmatpush3.bf16.msra.mxu1 %v424_v16 }
  0x52   :  { %373 = vmatprep.subr.bf16.mxu0 %v525_v0  ;;  %393 = vmatprep.subr.bf16.mxu1 %v525_v0 }
  0x55   :  { %374 = vmatpush3.bf16.msra.mxu0 %v416_v13  ;;  %394 = vmatpush3.bf16.msra.mxu1 %v425_v17 }
  0x58   :  { %376 = vmatmul.mubr.bf16.vlgmr.msra.gmra.mrb[0].mxu0 %v417_v15 }
 0x12b   :  { %v176_v19 = vpop.f32.mrb[0].mxu0 }
 0x12c   :  { %v177_v20 = vadd.f32 %v322_v18, %v176_v19  ;;  %v377_v21 = vpop.f32.mrb[1].mxu0 }
 0x12d   :  { %v179_v22 = vpop.f32.mrb[2].mxu0 }
 0x12e   :  { %v185_v23 = vmul.f32 0.05, %v177_v20  ;;  %v180_v24 = vadd.f32 %v322_v18, %v179_v22  ;;  %v378_v25 = vpop.f32.mrb[3].mxu0  ;;  %vm183_vm1 = vcmp.ge.f32.partialorder %v177_v20, 0.0 }
 0x130   :  { %vm184_vm2 = vcmp.ge.f32.partialorder %v180_v24, 0.0  ;;  %v186_v26 = vmul.f32 0.05, %v180_v24  ;;  %v187_v27 = vsel %vm183_vm1, %v177_v20, %v185_v23 }
 0x132   :  { %v188_v28 = vsel %vm184_vm2, %v180_v24, %v186_v26 }
 0x133   :  { %v189_v29 = vpack.c.bf16 %v188_v28, %v187_v27 }
 0x135   :  { %396 = vmatmul.mubr.bf16.vlgmr.msra.gmra.mrb[0].mxu1 %v189_v29 }
 0x208   :  { %v295_v31 = vpop.f32.mrb[0].mxu1 }
 0x209   :  { %v296_v32 = vadd.f32 %v332_v30, %v295_v31  ;;  %v397_v33 = vpop.f32.mrb[1].mxu1 }
 0x20a   :  { %v298_v34 = vpop.f32.mrb[2].mxu1 }
 0x20b   :  { %302 = vst [vmem:[#allocation8] sm:$0xff] %v296_v32  ;;  %v299_v35 = vadd.f32 %v332_v30, %v298_v34  ;;  %v398_v36 = vpop.f32.mrb[3].mxu1 }
 0x20d   :  { %303 = vst [vmem:[#allocation8 + $0x8] sm:$0xff] %v299_v35 }
 0x20e   :  { %503 = shalt.err (!%p500_p0)
}
 0x20f   :  { %s504_s10 = scalar_lea.hbm %s635_s5, 256 }
 0x210   :  { %p505_p1 = scmp.ne.s32.totalorder %s635_s5, %s504_s10  ;;  %p508_p2 = scmp.lt.u32.totalorder %s504_s10, %s635_s5 }
 0x212   :  { %p510_p3 = pnand %p508_p2, %p505_p1 }
 0x214   :  { %513 = shalt.err (!%p510_p3)
}
 0x215   :  { %s528_s15 = smov 128   ;;  %s529_s16 = smov 8  }
 0x216   :  { %315 = dma.vmem_to_hbm [thread:$0]  %s310_s2, 256, %s635_s5, [#allocation4], %s528_s15, %s528_s15, %s529_s16  }
 0x217   :  { %518 = dma.done.wait [#allocation4], 256  }
 0x218   :  { %519 = vsyncadd [#allocation4], 4294967040 }
 0x219   :  { %319 = vsyncpa [#allocation3], 1 }
 0x21a   :  { %320 = vsyncpa [#allocation6], 1 }
 0x21b   :  { %321 = vsyncpa [#allocation4], 1 }

</bundles_post_ra>
